<compile_context>
chip_gen: v6e
topology: v6e:2x2x1
jax: 0.10.0
libtpu: 0.0.40
codegen_flags: <defaults>
</compile_context>

<pallas_src>
import jax
import jax.numpy as jnp
from jax.experimental import pallas as pl
from jax.experimental.pallas import tpu as pltpu


# ----------------------------- kernels (one per mode) -----------------------------

def _add_kernel(x_ref, b_ref, o_ref):
    # b_ref holds b (or b - fixed_b when enable_ssf), shape (1, size) -> broadcasts over rows.
    o_ref[...] = (x_ref[...] + b_ref[...]).astype(o_ref.dtype)


def _mul_kernel(x_ref, v_ref, o_ref):
    o_ref[...] = (x_ref[...] * v_ref[...]).astype(o_ref.dtype)


def _mul_add_kernel(x_ref, v_ref, b_ref, o_ref):
    o_ref[...] = (x_ref[...] * v_ref[...] + b_ref[...]).astype(o_ref.dtype)


# ----------------------------- tiling helpers -----------------------------

def _sublane(dtype) -> int:
    # Minimum second-to-last-dim tile multiple for packed dtypes.
    return {4: 8, 2: 16, 1: 32}.get(jnp.dtype(dtype).itemsize, 8)


def _choose_row_tile(N, size, x_dtype, out_dtype, target_bytes=8 << 20) -> int:
    """Pick a row tile giving ~target_bytes of combined (x + out) traffic per block."""
    sub = max(_sublane(x_dtype), _sublane(out_dtype))
    bytes_per_row = size * (jnp.dtype(x_dtype).itemsize + jnp.dtype(out_dtype).itemsize)
    rows = max(sub, (target_bytes // max(1, bytes_per_row)) // sub * sub)
    n_pad = pl.cdiv(N, sub) * sub
    rows = min(rows, n_pad)
    # Prefer >= 2 grid steps when N permits so v7x's two TensorCores both get work.
    if rows >= n_pad and n_pad >= 2 * sub:
        rows = pl.cdiv(n_pad, 2 * sub) * sub
    return int(rows)


# ----------------------------- forward wrapper -----------------------------

def node_prompt_forward(x, value, b, fixed_b, *, mode="add", enable_ssf=False, row_tile=None):
    """Pallas implementation of NodePrompt.forward.

    x:        [N, size]
    value:    [1, size]
    b:        [1, size]
    fixed_b:  [1, size]
    """
    N, size = x.shape
    for p in (value, b, fixed_b):
        assert p.shape == (1, size)

    # Select kernel and exactly the params it needs (fewer DMAs / VMEM buffers).
    if mode == "add":
        # enable_ssf only affects 'add' mode, matching the PyTorch module.
        b_eff = (b - fixed_b) if enable_ssf else b
        params = (b_eff,)
        kernel = _add_kernel
    elif mode == "mul":
        params = (value,)
        kernel = _mul_kernel
    elif mode == "mul_add":
        params = (value, b)
        kernel = _mul_add_kernel
    else:
        raise ValueError(f"unknown mode: {mode!r}")

    out_dtype = jnp.result_type(x.dtype, *(p.dtype for p in params))

    if row_tile is None:
        row_tile = _choose_row_tile(N, size, x.dtype, out_dtype)
    else:
        sub = max(_sublane(x.dtype), _sublane(out_dtype))
        assert row_tile % sub == 0, f"row_tile must be a multiple of {sub} for these dtypes"

    grid = (pl.cdiv(N, row_tile),)  # ragged last block is padded/masked by Pallas

    x_spec = pl.BlockSpec((row_tile, size), lambda i: (i, 0))
    out_spec = pl.BlockSpec((row_tile, size), lambda i: (i, 0))
    param_spec = pl.BlockSpec((1, size), lambda i: (0, 0))  # resident across all steps

    # VMEM budget: double-buffered x + out tiles plus the tiny params; keep it
    # comfortably below v7x's 64 MiB physical VMEM while above v5e's 16 MiB default.
    bytes_per_row = size * (jnp.dtype(x.dtype).itemsize + jnp.dtype(out_dtype).itemsize)
    param_bytes = sum(size * jnp.dtype(p.dtype).itemsize for p in params)
    vmem_need = 2 * row_tile * bytes_per_row + 4 * param_bytes + (2 << 20)
    vmem_limit = int(min(56 << 20, max(32 << 20, vmem_need)))

    return pl.pallas_call(
        kernel,
        out_shape=jax.ShapeDtypeStruct((N, size), out_dtype),
        grid_spec=pltpu.PrefetchScalarGridSpec(
            num_scalar_prefetch=0,
            grid=grid,
            in_specs=[x_spec] + [param_spec] * len(params),
            out_specs=out_spec,
        ),
        compiler_params=pltpu.CompilerParams(
            dimension_semantics=("parallel",),
            vmem_limit_bytes=vmem_limit,
        ),
    )(x, *params)


# ----------------------------- self-test -----------------------------

if __name__ == "__main__":
    key = jax.random.PRNGKey(0)
    k_x, k_v, k_b, k_fb, k_x2 = jax.random.split(key, 5)

    size = 256  # lane-aligned feature dim

    # Deterministic "parameters" mimicking NodePrompt.init_weights:
    #   value ~ N(mean=1, std=0.02), b ~ N(0, std=0.02); fixed_b is a snapshot of b
    # (perturbed here so the ssf path is non-trivial).
    value = 1.0 + 0.02 * jax.random.normal(k_v, (1, size), dtype=jnp.float32)
    b = 0.02 * jax.random.normal(k_b, (1, size), dtype=jnp.float32)
    fixed_b = b + 0.01 * jax.random.normal(k_fb, (1, size), dtype=jnp.float32)

    # Case A: small aligned N (f32).
    x = jax.random.normal(k_x, (16, size), dtype=jnp.float32)
    cases = [
        ("add", False, x + b),
        ("add", True, x + b - fixed_b),
        ("mul", False, x * value),
        ("mul_add", False, x * value + b),
    ]
    for mode, ssf, ref in cases:
        out = jax.block_until_ready(node_prompt_forward(x, value, b, fixed_b, mode=mode, enable_ssf=ssf))
        assert out.shape == ref.shape and out.dtype == ref.dtype
        assert jnp.allclose(out, ref, atol=1e-6, rtol=1e-6), f"mismatch mode={mode}, ssf={ssf}"

    # Case B: ragged N (exercises cdiv grid + masked last block).
    x_ragged = jax.random.normal(k_x2, (20, size), dtype=jnp.float32)
    out = jax.block_until_ready(node_prompt_forward(x_ragged, value, b, fixed_b, mode="mul_add"))
    ref = x_ragged * value + b
    assert jnp.allclose(out, ref, atol=1e-6, rtol=1e-6), "mismatch on ragged N"

    # Case C: bf16 x with f32 params (sublane-packed dtype path, explicit cast).
    x_bf16 = x.astype(jnp.bfloat16)
    out = jax.block_until_ready(node_prompt_forward(x_bf16, value, b, fixed_b, mode="add", enable_ssf=True))
    ref = x_bf16 + b - fixed_b  # promotes to f32, same as kernel
    assert out.dtype == ref.dtype
    assert jnp.allclose(out, ref, atol=1e-5, rtol=1e-5), "mismatch on bf16 input"

    print("KERNEL_OK")
</pallas_src>

<mosaic_0001>
module attributes {stable_mosaic.version = 11 : i64} {
  func.func @_add_kernel(%arg0: i32, %arg1: memref<8x256xf32, #tpu.memory_space<vmem>>, %arg2: memref<1x256xf32, #tpu.memory_space<vmem>>, %arg3: memref<8x256xf32, #tpu.memory_space<vmem>>) attributes {dimension_semantics = [#tpu.dimension_semantics<parallel>], iteration_bounds = array<i64: 2>, scalar_prefetch = 0 : i64, scratch_operands = 0 : i64, tpu.core_type = #tpu.core_type<tc>, window_params = [{transform_indices = @transform_0, window_bounds = array<i64: 8, 256>}, {pipeline_mode = #tpu.pipeline_mode<synchronous>, transform_indices = @transform_1, window_bounds = array<i64: 1, 256>}, {transform_indices = @transform_2, window_bounds = array<i64: 8, 256>}]} {
    %c0 = arith.constant 0 : index
    %c0_0 = arith.constant 0 : index
    %0 = vector.load %arg1[%c0, %c0_0] : memref<8x256xf32, #tpu.memory_space<vmem>>, vector<8x256xf32>
    %c0_1 = arith.constant 0 : index
    %c0_2 = arith.constant 0 : index
    %1 = vector.load %arg2[%c0_1, %c0_2] : memref<1x256xf32, #tpu.memory_space<vmem>>, vector<1x256xf32>
    %2 = vector.broadcast %1 : vector<1x256xf32> to vector<8x256xf32>
    %3 = arith.addf %0, %2 : vector<8x256xf32>
    %c0_3 = arith.constant 0 : index
    %c0_4 = arith.constant 0 : index
    %4 = vector.load %arg3[%c0_3, %c0_4] : memref<8x256xf32, #tpu.memory_space<vmem>>, vector<8x256xf32>
    tpu.vector_store %arg3[%c0_3, %c0_4], %3 {strides = array<i32>} : memref<8x256xf32, #tpu.memory_space<vmem>>, vector<8x256xf32>,
    return
  }
  func.func @transform_0(%arg0: i32) -> (i32, i32) {
    %c0_i32 = arith.constant 0 : i32
    %c0_i32_0 = arith.constant 0 : i32
    return %arg0, %c0_i32 : i32, i32
  }
  func.func @transform_1(%arg0: i32) -> (i32, i32) {
    %c0_i32 = arith.constant 0 : i32
    %c0_i32_0 = arith.constant 0 : i32
    %c0_i32_1 = arith.constant 0 : i32
    return %c0_i32, %c0_i32_0 : i32, i32
  }
  func.func @transform_2(%arg0: i32) -> (i32, i32) {
    %c0_i32 = arith.constant 0 : i32
    %c0_i32_0 = arith.constant 0 : i32
    return %arg0, %c0_i32 : i32, i32
  }
}

</mosaic_0001>

<bundles_post_ra>
// kernel: tpu_custom_call.1
= control target key start
LH: loop header
LB: loop body
LE: loop exit
PB: predicated region body
PF: predicated region fallthrough
CT: control target
= control target key end

     0   :  { %7 = vsyncpa [#allocation3], 0  ;;  %s675_s0 = inlined_call_operand.hbm [shape: f32[16,256], index: 0, kind: input, shape index: {}]   ;;  %s676_s1 = inlined_call_operand.hbm [shape: f32[1,256], index: 1, kind: input, shape index: {}]   ;;  %s677_s2 = inlined_call_operand.hbm [shape: f32[16,256], index: 2, kind: output, shape index: {}]  }
   0x1   :  { %9 = vsyncpa [#allocation3 + $0x1], 0 }
   0x2   :  { %10 = vsyncpa [#allocation6], 0 }
   0x3   :  { %11 = vsyncpa [#allocation4], 0 }
   0x4   :  { %13 = vsyncpa [#allocation4 + $0x1], 0  ;;  %s503_s9 = smov 0   ;;  %s505_s10 = smov 0  }
   0x5   :  { %s507_s11 = smov 0   ;;  %s509_s12 = smov 0  }
   0x6 LB: > { %s524_s13 = sadd.s32 4294967295, %s483_s12   ;;  %s286_s14 = sadd.s32 4294967294, %s483_s12   ;;  %s483_s12 = sphi %s509_s12, %s700_s12   ;;  %s479_s11 = sphi %s507_s11, %s699_s11   ;;  %s475_s10 = sphi %s505_s10, %s698_s10   ;;  %s471_s9 = sphi %s503_s9, %s697_s9  }
   0x7   : > { %p39_p0 = scmp.ne.s32.totalorder %s475_s10, %s471_s9  ;;  %p678_p1 = scmp.eq.s32.totalorder %s524_s13, 0 }
   0x8   : > { %p90_p3 = scmp.eq.s32.totalorder %s286_s14, 1  ;;  %p287_p5 = scmp.ge.s32.totalorder %s483_s12, 1 }
   0x9   : > { %p533_p4 = por %p678_p1, %p39_p0  ;;  %p97_p7 = scmp.lt.s32.totalorder %s483_s12, 3 }
   0xa   : > { %p538_p6 = por %p90_p3, %p39_p0  ;;  %s485_s18 = smov [#allocation5]  }
   0xb   : > { %s682_s15 = scalar_select %p533_p4, 1, 0 }
   0xc   : > { %s683_s16 = scalar_select %p538_p6, 1, 0 }
   0xd   : > { %p543_p8 = pnand %p287_p5, %p97_p7  ;;  %s110_s19 = sshll.u32 %s485_s18, 4  ;;  %s111_s19 = int_to_ptr.vmem [resolvable:$true] %s110_s19 }
   0xe   : > { %s551_s20 = sadd.s32 1, %s483_s12   ;;  %s26_s24 = sadd.s32 1, %s479_s11 }
   0xf   : > { %s684_s17 = scalar_select %p543_p8, 1, 0 }
  0x10   : > { %p312_p10 = pneg %p543_p8  ;;  %s23_s22 = ssub.s32 %s483_s12, %s551_s20 }
  0x11   : > { %p561_p12 = scmp.eq.s32.totalorder %s23_s22, 0  ;;  %p33_p13 = scmp.ne.s32.totalorder %s479_s11, %s475_s10 }
  0x12   : > { %p555_p11 = pnand %p312_p10, %p678_p1  ;;  %s372_s25 = scalar_lea.vmem %s111_s19, 32 }
  0x13   : > { %p373_p3 = scmp.ne.s32.totalorder %s111_s19, %s372_s25  ;;  %p380_p9 = scmp.lt.s32.totalorder %s111_s19, %s111_s19 }
  0x14   : > { %p363_p0 = pneg %p555_p11  ;;  %p381_p2 = scmp.lt.s32.totalorder %s372_s25, %s372_s25 }
  0x16   : > { %p375_p5 = pnand %p373_p3, %p363_p0  ;;  %p382_p10 = por %p381_p2, %p380_p9 }
  0x18   : > { %p376_p7 = pneg %p375_p5 }
  0x1a   : > { %p383_p1 = pnand %p382_p10, %p376_p7 }
  0x1c   : > { %386 = shalt.err (!%p383_p1)
}
  0x1d   : > { %315 = dma.hbm_to_vmem [thread:$0]  (!%p555_p11), %s676_s1, 32, %s111_s19, [#allocation6]  }
  0x1e   : > { %s578_s28 = scalar_select %p561_p12, %s479_s11, %s26_s24  }
  0x1f   : > { %p34_p1 = scmp.eq.s32.totalorder %s483_s12, 0  ;;  %p687_p2 = scmp.eq.s32.totalorder %s524_s13, 1 }
  0x20   : > { %p325_p0 = scmp.lt.s32.totalorder %s483_s12, 2  ;;  %s121_s30 = sand.u32 1, %s479_s11  }
  0x21   : > { %p586_p9 = por %p687_p2, %p33_p13  ;;  %p35_p3 = por %p34_p1, %p33_p13 }
  0x22   : > { %s290_s3 = sshll.u32 %s121_s30, 4  ;;  %s302_s4 = sshll.u32 %s483_s12, 8 }
  0x23   : > { %s688_s29 = scalar_select %p586_p9, 1, 0 }
  0x24   : > { %s599_s7 = scalar_lea.hbm %s675_s0, %s302_s4  ;;  %s125_s8 = scalar_lea.vmem [#allocation2], %s290_s3 }
  0x25   : > { %s133_s14 = sshll.u32 %s125_s8, 4  ;;  %p601_p11 = pnand %p325_p0, %p35_p3  ;;  %s134_s14 = int_to_ptr.vmem [resolvable:$true] %s133_s14 }
  0x26   : > { %s122_s19 = scalar_lea.sflag [#allocation3], %s121_s30  ;;  %s387_s21 = scalar_lea.hbm %s599_s7, 256 }
  0x27   : > { %p388_p12 = scmp.ne.s32.totalorder %s599_s7, %s387_s21  ;;  %p389_p13 = pneg %p601_p11 }
  0x28   : > { %s392_s24 = scalar_lea.hbm %s675_s0, 512  ;;  %p393_p10 = scmp.lt.s32.totalorder %s599_s7, %s675_s0 }
  0x29   : > { %p390_p5 = pnand %p389_p13, %p388_p12  ;;  %p394_p1 = scmp.lt.s32.totalorder %s392_s24, %s387_s21 }
  0x2b   : > { %p391_p7 = pneg %p390_p5  ;;  %p395_p2 = por %p394_p1, %p393_p10 }
  0x2d   : > { %p396_p0 = pnand %p395_p2, %p391_p7 }
  0x2f   : > { %399 = shalt.err (!%p396_p0)
}
  0x30   : > { %s400_s27 = scalar_lea.vmem %s134_s14, 256  ;;  %s486_s30 = smov [#allocation2]  }
  0x31   : > { %p401_p3 = scmp.ne.s32.totalorder %s134_s14, %s400_s27  ;;  %s405_s3 = sshll.u32 %s486_s30, 4  ;;  %s406_s3 = int_to_ptr.vmem [resolvable:$false] %s405_s3 }
  0x32   : > { %s407_s4 = scalar_lea.vmem %s406_s3, 512  ;;  %p408_p12 = scmp.lt.s32.totalorder %s134_s14, %s406_s3 }
  0x33   : > { %p403_p6 = pnand %p401_p3, %p389_p13  ;;  %p409_p5 = scmp.lt.s32.totalorder %s407_s4, %s400_s27 }
  0x35   : > { %p404_p9 = pneg %p403_p6  ;;  %p410_p4 = por %p409_p5, %p408_p12 }
  0x37   : > { %p411_p8 = pnand %p410_p4, %p404_p9 }
  0x39   : > { %414 = shalt.err (!%p411_p8)
}
  0x3a   : > { %319 = dma.hbm_to_vmem [thread:$0]  (!%p601_p11), %s599_s7, 256, %s134_s14, %s122_s19  }
  0x3b   : > { %p690_p7 = scmp.ne.s32.totalorder %s684_s17, 0 }
  0x3c   : > { %s622_s5 = sand.u32 (!%p690_p7), 1, %s475_s10   ;;  %p691_p6 = scmp.ne.s32.totalorder (!%p690_p7), %s682_s15, 0 }
  0x3d   : > { %142 = sbr.rel (%p690_p7) target bundleno = 95 (0x5f), region = 28  ;;  %s294_s6 = sshll.u32 (!%p690_p7), %s622_s5, 4 }
  0x3e   : > { %s145_s8 = scalar_lea.sflag (!%p690_p7), [#allocation3], %s622_s5  ;;  %s148_s21 = scalar_lea.vmem (!%p690_p7), [#allocation2], %s294_s6 }
  0x42   : > { %458 = dma.done.wait (%p691_p6), %s145_s8, 256  }
  0x43   : > { %460 = vsyncadd (%p691_p6), %s145_s8, 4294967040  ;;  %p692_p4 = scmp.eq.s32.totalorder %s524_s13, 0 }
  0x45   : > { %462 = dma.done.wait (%p692_p4), [#allocation6], 32   ;;  %p693_p8 = pmov %p692_p4 }
  0x46   : > { %v177_v0 = vlaneseq  ;;  %v173_v4 = vld [vmem:[%s148_s21] sm:$0xff]  ;;  %s172_s17 = scalar_lea.vmem [#allocation7], %s294_s6  ;;  %v174_v6 = vld [vmem:[%s148_s21 + $0x8] sm:$0xff]  ;;  %s303_s15 = sshll.u32 %s524_s13, 8 }
  0x47   : > { %464 = vsyncadd (%p693_p8), [#allocation6], 4294967264  ;;  %v175_v5 = vld [vmem:[#allocation5] sm:$0x3]  ;;  %s206_s7 = sshll.u32 %s172_s17, 4  ;;  %s204_s19 = scalar_lea.hbm %s677_s2, %s303_s15  ;;  %s635_s7 = int_to_ptr.vmem [resolvable:$true] %s206_s7 }
  0x48   : > { %v178_v1 = vshrl.u32 %v177_v0, 7  ;;  %s192_s22 = scalar_lea.sflag [#allocation4], %s622_s5  ;;  %s415_s23 = scalar_lea.vmem %s635_s7, 256 }
  0x49   : > { %p416_p9 = scmp.ne.s32.totalorder %s635_s7, %s415_s23  ;;  %p694_p11 = scmp.ne.s32.totalorder %s688_s29, 0 }
  0x4a   : > { %v179_v2 = vsub.s32 0, %v178_v1  ;;  %v183_v3 = vsub.s32 1, %v178_v1  ;;  %s487_s13 = smov [#allocation7]  }
  0x4b   : > { %p417_p13 = pnand %p416_p9, %p694_p11  ;;  %s419_s24 = sshll.u32 %s487_s13, 4  ;;  %s420_s24 = int_to_ptr.vmem [resolvable:$false] %s419_s24 }
  0x4c   : > { %v180_v7 = vrot.slane %v175_v5, %v179_v2  ;;  %v184_v8 = vrot.slane %v175_v5, %v183_v3  ;;  %s421_s25 = scalar_lea.vmem %s420_s24, 512  ;;  %p422_p1 = scmp.lt.s32.totalorder %s635_s7, %s420_s24 }
  0x4d   : > { %p418_p10 = pneg %p417_p13  ;;  %p423_p2 = scmp.lt.s32.totalorder %s421_s25, %s415_s23 }
  0x4e   : > { %v187_v9 = vadd.f32 %v180_v7, %v173_v4  ;;  %v188_v10 = vadd.f32 %v184_v8, %v174_v6 }
  0x4f   : > { %p424_p0 = por %p423_p2, %p422_p1 }
  0x50   : > { %189 = vst [vmem:[%s172_s17] sm:$0xff] %v187_v9  ;;  %190 = vst [vmem:[%s172_s17 + $0x8] sm:$0xff] %v188_v10 }
  0x51   : > { %p425_p3 = pnand %p424_p0, %p418_p10 }
  0x53   : > { %428 = shalt.err (!%p425_p3)
}
  0x54   : > { %s429_s26 = scalar_lea.hbm %s204_s19, 256  ;;  %s433_s3 = scalar_lea.hbm %s677_s2, 512 }
  0x55   : > { %p430_p12 = scmp.ne.s32.totalorder %s204_s19, %s429_s26  ;;  %p434_p6 = scmp.lt.s32.totalorder %s204_s19, %s677_s2 }
  0x56   : > { %p435_p4 = scmp.lt.s32.totalorder %s433_s3, %s429_s26 }
  0x57   : > { %p431_p5 = pnand %p430_p12, %p694_p11 }
  0x58   : > { %p436_p8 = por %p435_p4, %p434_p6 }
  0x59   : > { %p432_p7 = pneg %p431_p5 }
  0x5b   : > { %p437_p9 = pnand %p436_p8, %p432_p7 }
  0x5d   : > { %440 = shalt.err (!%p437_p9)
}
  0x5e   : > { %310 = dma.vmem_to_hbm [thread:$0]  (%p694_p11), %s635_s7, 256, %s204_s19, %s192_s22  }
  0x5f PF: > { %s218_s6 = sand.u32 1, %s471_s9   ;;  %p695_p13 = scmp.ne.s32.totalorder %s683_s16, 0 }
  0x60   : > { %p696_p10 = scmp.ge.s32.totalorder %s483_s12, 2  ;;  %s219_s8 = scalar_lea.sflag [#allocation4], %s218_s6 }
  0x62   : > { %p321_p1 = pnand %p696_p10, %p695_p13 }
  0x64   : > { %p322_p2 = pneg %p321_p1 }
  0x66   : > { %466 = dma.done.wait (%p322_p2), %s219_s8, 256  }
  0x67   : > { %468 = vsyncadd (%p322_p2), %s219_s8, 4294967040  ;;  %p16_p0 = scmp.ge.s32.totalorder %s551_s20, 4   ;;  %s697_s9 = smov %s475_s10 }
  0x68   : > { %s698_s10 = smov %s479_s11  ;;  %s699_s11 = smov %s578_s28 }
  0x69   : > { %s700_s12 = smov %s551_s20  ;;  %18 = sbr.rel (!%p16_p0) target bundleno = 6 (0x6), region = 77 }
  0x6e   :  { %224 = vsyncpa [#allocation3], 1 }
  0x6f   :  { %226 = vsyncpa [#allocation3 + $0x1], 1 }
  0x70   :  { %227 = vsyncpa [#allocation6], 1 }
  0x71   :  { %228 = vsyncpa [#allocation4], 1 }
  0x72   :  { %230 = vsyncpa [#allocation4 + $0x1], 1 }

</bundles_post_ra>
